<compile_context>
chip_gen: v7x
topology: tpu7x:2x2x1
jax: 0.10.0
libtpu: 0.0.40
codegen_flags: <defaults>
</compile_context>

<pallas_src>
import functools
import math

import jax
import jax.numpy as jnp
from jax.experimental import pallas as pl
from jax.experimental.pallas import tpu as pltpu


# ----------------------------------------------------------------------------
# Helpers
# ----------------------------------------------------------------------------
def _eca_kernel_size(channel, b=1, gamma=2):
    """Replicates the PyTorch ECA kernel-size formula."""
    k = int(abs((math.log(channel, 2) + b) / gamma))
    return k if k % 2 else k + 1


def _pick_tile(total, target, quantum):
    """Largest multiple of `quantum` dividing `total` that is <= target,
    else the full extent (always satisfies the TPU block-shape constraint)."""
    best = None
    d = quantum
    lim = min(total, target)
    while d <= lim:
        if total % d == 0:
            best = d
        d += quantum
    return best if best is not None else total


# ----------------------------------------------------------------------------
# Kernel 1: global average pool as a tiled row-wise reduction.
#   x_ref:   (TR, TL)   tile of x viewed as (N*C, H*W)
#   o_ref:   (TR, 1)    per-row mean (f32), written on the last lane tile
#   acc_ref: (TR, 1)    f32 VMEM accumulator (persists across the lane axis)
# ----------------------------------------------------------------------------
def _global_avgpool_kernel(x_ref, o_ref, acc_ref, *, inv_hw):
    j = pl.program_id(1)

    @pl.when(j == 0)
    def _():
        acc_ref[...] = jnp.zeros_like(acc_ref)

    acc_ref[...] += jnp.sum(x_ref[...].astype(jnp.float32), axis=-1,
                            keepdims=True)

    @pl.when(j == pl.num_programs(1) - 1)
    def _():
        o_ref[...] = (acc_ref[...] * inv_hw).astype(o_ref.dtype)


# ----------------------------------------------------------------------------
# Kernel 2: 1-D conv over channels + sigmoid on the tiny pooled tensor.
#   p_ref: (N, C + 2*pad)  zero-padded pooled values (f32, VMEM)
#   w_ref: (k,)            conv taps (f32, SMEM -> scalar reads)
#   o_ref: (N, C)          sigmoid(conv) scale (f32)
# ----------------------------------------------------------------------------
def _conv1d_sigmoid_kernel(p_ref, w_ref, o_ref, *, ksize, channels):
    p = p_ref[...]
    acc = p[:, 0:channels] * w_ref[0]
    for j in range(1, ksize):
        acc = acc + p[:, j:j + channels] * w_ref[j]
    o_ref[...] = jax.nn.sigmoid(acc).astype(o_ref.dtype)


# ----------------------------------------------------------------------------
# Kernel 3: broadcast multiply x * scale, tiled over (rows, lanes).
#   x_ref: (TR, TL)   tile of x viewed as (N*C, H*W)
#   s_ref: (TR, 1)    per-row scale (f32)
#   o_ref: (TR, TL)
# ----------------------------------------------------------------------------
def _scale_mul_kernel(x_ref, s_ref, o_ref):
    o_ref[...] = (x_ref[...].astype(jnp.float32) * s_ref[...]).astype(o_ref.dtype)


# ----------------------------------------------------------------------------
# Wrapper: ECA forward (NCHW in / NCHW out, like the PyTorch module).
# ----------------------------------------------------------------------------
def eca_forward(x_nchw, w_conv, *, tile_rows_target=256, tile_lanes_target=1024):
    n, c, h, w = x_nchw.shape
    k = w_conv.shape[0]
    pad = (k - 1) // 2

    rows = n * c
    lanes = h * w
    x2 = x_nchw.reshape(rows, lanes)          # free view of contiguous NCHW data

    tr = _pick_tile(rows, tile_rows_target, 8)
    tl = _pick_tile(lanes, tile_lanes_target, 128)

    # ---- stage 1: global average pool (tiled, pipelined reduction) --------
    pooled = pl.pallas_call(
        functools.partial(_global_avgpool_kernel, inv_hw=1.0 / float(lanes)),
        out_shape=jax.ShapeDtypeStruct((rows, 1), jnp.float32),
        grid_spec=pltpu.PrefetchScalarGridSpec(
            num_scalar_prefetch=0,
            grid=(rows // tr, lanes // tl),
            in_specs=[pl.BlockSpec((tr, tl), lambda i, j: (i, j))],
            out_specs=pl.BlockSpec((tr, 1), lambda i, j: (i, 0)),
            scratch_shapes=[pltpu.VMEM((tr, 1), jnp.float32)],
        ),
        compiler_params=pltpu.CompilerParams(
            dimension_semantics=("parallel", "arbitrary")),
    )(x2)

    # ---- stage 2: conv1d over channels + sigmoid (tiny) --------------------
    pooled_nc = pooled.reshape(n, c)
    pooled_pad = jnp.pad(pooled_nc, ((0, 0), (pad, pad)))   # tiny (N, C+2*pad)
    scale = pl.pallas_call(
        functools.partial(_conv1d_sigmoid_kernel, ksize=k, channels=c),
        out_shape=jax.ShapeDtypeStruct((n, c), jnp.float32),
        in_specs=[pl.BlockSpec(memory_space=pltpu.MemorySpace.VMEM),
                  pl.BlockSpec(memory_space=pltpu.MemorySpace.SMEM)],
        out_specs=pl.BlockSpec(memory_space=pltpu.MemorySpace.VMEM),
    )(pooled_pad, w_conv.astype(jnp.float32))

    # ---- stage 3: x * scale (tiled, both axes parallel) --------------------
    scale_rows = scale.reshape(rows, 1)
    out2 = pl.pallas_call(
        _scale_mul_kernel,
        out_shape=jax.ShapeDtypeStruct((rows, lanes), x_nchw.dtype),
        grid_spec=pltpu.PrefetchScalarGridSpec(
            num_scalar_prefetch=0,
            grid=(rows // tr, lanes // tl),
            in_specs=[pl.BlockSpec((tr, tl), lambda i, j: (i, j)),
                      pl.BlockSpec((tr, 1), lambda i, j: (i, 0))],
            out_specs=pl.BlockSpec((tr, tl), lambda i, j: (i, j)),
        ),
        compiler_params=pltpu.CompilerParams(
            dimension_semantics=("parallel", "parallel")),
    )(x2, scale_rows)

    return out2.reshape(n, c, h, w)


# ----------------------------------------------------------------------------
# Pure-JAX reference (for correctness check only).
# ----------------------------------------------------------------------------
def eca_reference(x, w_conv):
    n, c, h, w = x.shape
    k = w_conv.shape[0]
    pad = (k - 1) // 2
    pooled = x.astype(jnp.float32).mean(axis=(2, 3))           # (N, C)
    pp = jnp.pad(pooled, ((0, 0), (pad, pad)))
    conv = sum(pp[:, j:j + c] * w_conv[j] for j in range(k))
    scale = jax.nn.sigmoid(conv)
    return (x.astype(jnp.float32) * scale[:, :, None, None]).astype(x.dtype)


if __name__ == "__main__":
    key = jax.random.PRNGKey(0)
    k_x, k_w = jax.random.split(key)

    N, C, H, W = 2, 16, 16, 16          # C=16 -> ECA kernel_size = 3
    KSIZE = _eca_kernel_size(C)          # replicates torch formula (b=1, gamma=2)

    x = jax.random.normal(k_x, (N, C, H, W), jnp.float32)
    # torch Conv1d weight has shape (1, 1, k); store it squeezed as (k,)
    w_conv = 0.5 * jax.random.normal(k_w, (KSIZE,), jnp.float32)

    out = eca_forward(x, w_conv)
    out = jax.block_until_ready(out)

    ref = eca_reference(x, w_conv)
    assert out.shape == ref.shape == (N, C, H, W)
    assert jnp.allclose(out, ref, atol=1e-5, rtol=1e-5), "mismatch vs reference"

    print("KERNEL_OK")
</pallas_src>

<mosaic_0001>
module attributes {stable_mosaic.version = 11 : i64} {
  func.func @_global_avgpool_kernel(%arg0: i32, %arg1: i32, %arg2: memref<32x256xf32, #tpu.memory_space<vmem>>, %arg3: memref<32x1xf32, #tpu.memory_space<vmem>>, %arg4: memref<32x1xf32, #tpu.memory_space<vmem>>) attributes {dimension_semantics = [#tpu.dimension_semantics<parallel>, #tpu.dimension_semantics<arbitrary>], iteration_bounds = array<i64: 1, 1>, scalar_prefetch = 0 : i64, scratch_operands = 1 : i64, tpu.core_type = #tpu.core_type<tc>, window_params = [{transform_indices = @transform_0, window_bounds = array<i64: 32, 256>}, {transform_indices = @transform_1, window_bounds = array<i64: 32, 1>}]} {
    %c0_i32 = arith.constant 0 : i32
    %0 = arith.cmpi eq, %arg1, %c0_i32 : i32
    %1 = arith.extui %0 : i1 to i32
    %c0_i32_0 = arith.constant 0 : i32
    %2 = arith.cmpi ne, %1, %c0_i32_0 : i32
    scf.if %2 {
      %cst_8 = arith.constant 0.000000e+00 : f32
      %12 = vector.broadcast %cst_8 : f32 to vector<32x1xf32>
      %c0_9 = arith.constant 0 : index
      %c0_10 = arith.constant 0 : index
      %13 = vector.load %arg4[%c0_9, %c0_10] : memref<32x1xf32, #tpu.memory_space<vmem>>, vector<32x1xf32>
      tpu.vector_store %arg4[%c0_9, %c0_10], %12 {strides = array<i32>} : memref<32x1xf32, #tpu.memory_space<vmem>>, vector<32x1xf32>,
    } else {
    }
    %c0 = arith.constant 0 : index
    %c0_1 = arith.constant 0 : index
    %3 = vector.load %arg4[%c0, %c0_1] : memref<32x1xf32, #tpu.memory_space<vmem>>, vector<32x1xf32>
    %c0_2 = arith.constant 0 : index
    %c0_3 = arith.constant 0 : index
    %4 = vector.load %arg2[%c0_2, %c0_3] : memref<32x256xf32, #tpu.memory_space<vmem>>, vector<32x256xf32>
    %cst = arith.constant dense<0.000000e+00> : vector<32xf32>
    %5 = vector.multi_reduction <add>, %4, %cst [1] : vector<32x256xf32> to vector<32xf32>
    %6 = vector.shape_cast %5 : vector<32xf32> to vector<32x1xf32>
    %7 = arith.addf %3, %6 : vector<32x1xf32>
    %c0_4 = arith.constant 0 : index
    %c0_5 = arith.constant 0 : index
    %8 = vector.load %arg4[%c0_4, %c0_5] : memref<32x1xf32, #tpu.memory_space<vmem>>, vector<32x1xf32>
    tpu.vector_store %arg4[%c0_4, %c0_5], %7 {strides = array<i32>} : memref<32x1xf32, #tpu.memory_space<vmem>>, vector<32x1xf32>,
    %c0_i32_6 = arith.constant 0 : i32
    %9 = arith.cmpi eq, %arg1, %c0_i32_6 : i32
    %10 = arith.extui %9 : i1 to i32
    %c0_i32_7 = arith.constant 0 : i32
    %11 = arith.cmpi ne, %10, %c0_i32_7 : i32
    scf.if %11 {
      %c0_8 = arith.constant 0 : index
      %c0_9 = arith.constant 0 : index
      %12 = vector.load %arg4[%c0_8, %c0_9] : memref<32x1xf32, #tpu.memory_space<vmem>>, vector<32x1xf32>
      %cst_10 = arith.constant 3.906250e-03 : f32
      %13 = vector.broadcast %cst_10 : f32 to vector<32x1xf32>
      %14 = arith.mulf %12, %13 : vector<32x1xf32>
      %c0_11 = arith.constant 0 : index
      %c0_12 = arith.constant 0 : index
      %15 = vector.load %arg3[%c0_11, %c0_12] : memref<32x1xf32, #tpu.memory_space<vmem>>, vector<32x1xf32>
      tpu.vector_store %arg3[%c0_11, %c0_12], %14 {strides = array<i32>} : memref<32x1xf32, #tpu.memory_space<vmem>>, vector<32x1xf32>,
    } else {
    }
    return
  }
  func.func @transform_0(%arg0: i32, %arg1: i32) -> (i32, i32) {
    %c0_i32 = arith.constant 0 : i32
    return %arg0, %arg1 : i32, i32
  }
  func.func @transform_1(%arg0: i32, %arg1: i32) -> (i32, i32) {
    %c0_i32 = arith.constant 0 : i32
    %c0_i32_0 = arith.constant 0 : i32
    return %arg0, %c0_i32 : i32, i32
  }
}

</mosaic_0001>

<bundles_post_ra>
// kernel: tpu_custom_call.1
= control target key start
LH: loop header
LB: loop body
LE: loop exit
PB: predicated region body
PF: predicated region fallthrough
CT: control target
= control target key end

     0   :  { %6 = vsyncpa [#allocation4], 0  ;;  %s112_s6 = smov [#allocation3]   ;;  %s162_s0 = inlined_call_operand.hbm [shape: f32[32,256], index: 0, kind: input, shape index: {}]   ;;  %s163_s1 = inlined_call_operand.vmem [shape: f32[32,1], index: 1, kind: output, shape index: {}]  }
   0x1   :  { %s12_s7 = sshll.u32 %s112_s6, 4  ;;  %s88_s10 = scalar_lea.hbm %s162_s0, 1024  ;;  %s13_s7 = int_to_ptr.vmem [resolvable:$true] %s12_s7 }
   0x2   :  { %p89_p0 = scmp.ne.s32.totalorder %s162_s0, %s88_s10  ;;  %p92_p1 = scmp.lt.u32.totalorder %s88_s10, %s162_s0 }
   0x4   :  { %p94_p2 = pnand %p92_p1, %p89_p0 }
   0x6   :  { %97 = shalt.err (!%p94_p2)
}
   0x7   :  { %s98_s15 = scalar_lea.vmem %s13_s7, 1024  ;;  %p103_p4 = scmp.lt.s32.totalorder %s13_s7, %s13_s7 }
   0x8   :  { %p99_p3 = scmp.ne.s32.totalorder %s13_s7, %s98_s15  ;;  %p104_p5 = scmp.lt.s32.totalorder %s98_s15, %s98_s15 }
   0xa   :  { %p105_p6 = por %p104_p5, %p103_p4 }
   0xc   :  { %p106_p7 = pnand %p105_p6, %p99_p3 }
   0xe   :  { %109 = shalt.err (!%p106_p7)
}
   0xf   :  { %s113_s16 = smov 256   ;;  %s114_s17 = smov 16  }
  0x10   :  { %18 = dma.hbm_to_vmem [thread:$0]  %s162_s0, 1024, %s13_s7, [#allocation4], %s113_s16, %s113_s16, %s114_s17  }
  0x11   :  { %110 = dma.done.wait [#allocation4], 1024  }
  0x12   :  { %111 = vsyncadd [#allocation4], 4294966272  ;;  %vm26_vm0 = vcmask 7168   ;;  %v115_v0 = vmov 0.0   ;;  %v39_v1 = vld [vmem:[#allocation3 + $0x20] sm:$0xff]  ;;  %v40_v2 = vld [vmem:[#allocation3 + $0x28] sm:$0xff] }
  0x13   :  { %29 = vst.msk [vmem:[#allocation2 + $0x10] sm:$0xff] %vm26_vm0, %v115_v0  ;;  %27 = vst.msk [vmem:[#allocation2] sm:$0xff] %vm26_vm0, %v115_v0  ;;  %v35_v3 = vld [vmem:[#allocation3] sm:$0xff]  ;;  %v49_v4 = vadd.f32 %v40_v2, %v39_v1  ;;  %v36_v5 = vld [vmem:[#allocation3 + $0x8] sm:$0xff] }
  0x14   :  { %28 = vst.msk [vmem:[#allocation2 + $0x8] sm:$0xff] %vm26_vm0, %v115_v0  ;;  %30 = vst.msk [vmem:[#allocation2 + $0x18] sm:$0xff] %vm26_vm0, %v115_v0  ;;  %v41_v6 = vld [vmem:[#allocation3 + $0x30] sm:$0xff]  ;;  %v42_v7 = vld [vmem:[#allocation3 + $0x38] sm:$0xff]  ;;  %v43_v8 = vadd.f32 %v36_v5, %v35_v3 }
  0x15   :  { %v37_v9 = vld [vmem:[#allocation3 + $0x10] sm:$0xff]  ;;  %v38_v10 = vld [vmem:[#allocation3 + $0x18] sm:$0xff]  ;;  %50 = vadd.xlane.f32.xlu1 %v49_v4  ;;  %v52_v11 = vadd.f32 %v42_v7, %v41_v6 }
  0x16   :  { %44 = vadd.xlane.f32.xlu0 %v43_v8  ;;  %v46_v12 = vadd.f32 %v38_v10, %v37_v9 }
  0x19   :  { %53 = vadd.xlane.f32.xlu1 %v52_v11 }
  0x1a   :  { %47 = vadd.xlane.f32.xlu0 %v46_v12  ;;  %v33_v13 = vld [vmem:[#allocation2 + $0x10] sm:$0xff]  ;;  %v31_v14 = vld [vmem:[#allocation2] sm:$0xff] }
  0x1b   :  { %v34_v19 = vld [vmem:[#allocation2 + $0x18] sm:$0xff]  ;;  %v32_v20 = vld [vmem:[#allocation2 + $0x8] sm:$0xff] }
  0xa2   :  { %v51_v15 = vpop.xlane.xlu1 %50 }
  0xa3   :  { %v57_v16 = vadd.f32 %v51_v15, %v33_v13  ;;  %v45_v17 = vpop.xlane.xlu0 %44 }
  0xa4   :  { %v55_v18 = vadd.f32 %v45_v17, %v31_v14 }
  0xa5   :  { %62 = vst.msk [vmem:[#allocation2 + $0x10] sm:$0xff] %vm26_vm0, %v57_v16 }
  0xa6   :  { %60 = vst.msk [vmem:[#allocation2] sm:$0xff] %vm26_vm0, %v55_v18  ;;  %v54_v21 = vpop.xlane.xlu1 %53 }
  0xa7   :  { %v58_v22 = vadd.f32 %v54_v21, %v34_v19  ;;  %v48_v23 = vpop.xlane.xlu0 %47 }
  0xa8   :  { %v56_v24 = vadd.f32 %v48_v23, %v32_v20 }
  0xa9   :  { %63 = vst.msk [vmem:[#allocation2 + $0x18] sm:$0xff] %vm26_vm0, %v58_v22 }
  0xaa   :  { %61 = vst.msk [vmem:[#allocation2 + $0x8] sm:$0xff] %vm26_vm0, %v56_v24 }
  0xac   :  { %v69_v25 = vld [vmem:[#allocation2 + $0x10] sm:$0xff] }
  0xad   :  { %v73_v26 = vmul.f32 0.00390625, %v69_v25  ;;  %v67_v27 = vld [vmem:[#allocation2] sm:$0xff] }
  0xae   :  { %v71_v28 = vmul.f32 0.00390625, %v67_v27 }
  0xaf   :  { %77 = vst.msk [vmem:[%s163_s1 + $0x10] sm:$0xff] %vm26_vm0, %v73_v26 }
  0xb0   :  { %75 = vst.msk [vmem:[%s163_s1] sm:$0xff] %vm26_vm0, %v71_v28  ;;  %v70_v29 = vld [vmem:[#allocation2 + $0x18] sm:$0xff] }
  0xb1   :  { %v74_v30 = vmul.f32 0.00390625, %v70_v29  ;;  %v68_v31 = vld [vmem:[#allocation2 + $0x8] sm:$0xff] }
  0xb2   :  { %v72_v32 = vmul.f32 0.00390625, %v68_v31 }
  0xb3   :  { %78 = vst.msk [vmem:[%s163_s1 + $0x18] sm:$0xff] %vm26_vm0, %v74_v30 }
  0xb4   :  { %76 = vst.msk [vmem:[%s163_s1 + $0x8] sm:$0xff] %vm26_vm0, %v72_v32 }
  0xb5   :  { %83 = vsyncpa [#allocation4], 1 }

</bundles_post_ra>
